<compile_context>
chip_gen: v7x
topology: tpu7x:2x2x1
jax: 0.10.0
libtpu: 0.0.40
codegen_flags: <defaults>
</compile_context>

<pallas_src>
import functools

import jax
import jax.numpy as jnp
from jax.experimental import pallas as pl
from jax.experimental.pallas import tpu as pltpu


def _round_up(x, m):
    return ((x + m - 1) // m) * m


def _next_pow2(x):
    p = 1
    while p < x:
        p *= 2
    return p


# ---------------------------------------------------------------------------
# Bounded-range sine: one Cody-Waite reduction step + odd degree-11 polynomial.
# Accurate (<~1e-6 abs) for |z| up to a few thousand - far beyond the post
# omega-fold SIREN pre-activation range.  ~15 VPU ops per element.
# ---------------------------------------------------------------------------
_INV_PI = 0.3183098861837907
_PI_HI = 3.140625                  # exact in a handful of mantissa bits
_PI_LO = 9.6765358979e-4           # pi - _PI_HI
_S3 = -1.0 / 6.0
_S5 = 1.0 / 120.0
_S7 = -1.0 / 5040.0
_S9 = 1.0 / 362880.0
_S11 = -1.0 / 39916800.0


def _fast_sin(z):
    k = jnp.floor(z * _INV_PI + 0.5)           # nearest multiple of pi
    r = z - k * _PI_HI
    r = r - k * _PI_LO                         # r in ~[-pi/2, pi/2]
    parity = k - 2.0 * jnp.floor(0.5 * k)      # 0.0 even k, 1.0 odd k
    sign = 1.0 - 2.0 * parity                  # (-1)**k
    r2 = r * r
    p = r * (1.0 + r2 * (_S3 + r2 * (_S5 + r2 * (_S7 + r2 * (_S9 + r2 * _S11)))))
    return sign * p


def _siren_kernel(x_ref, w0_ref, b0_ref, wh_ref, bh_ref, wf_ref, bf_ref, o_ref,
                  *, hidden_layers, outermost_linear, mxu_bf16):
    cdt = jnp.bfloat16 if mxu_bf16 else jnp.float32

    # First sine layer: f32 operands (omega_0-scaled weights are large; K is
    # tiny so the MXU cost of staying f32 is negligible).
    h = jnp.dot(x_ref[...], w0_ref[...], preferred_element_type=jnp.float32)
    h = _fast_sin(h + b0_ref[...])

    # Hidden sine layers: packed block-diagonal weights stacked on axis 0,
    # statically unrolled.  Matmul operands in `cdt`, f32 accumulation; bias
    # add and sine in f32 (correct on v5e, fine everywhere).
    for l in range(hidden_layers):
        z = jnp.dot(h.astype(cdt), wh_ref[l], preferred_element_type=jnp.float32)
        h = _fast_sin(z + bh_ref[l])

    # Final layer: plain linear, or one more sine layer (omega already folded).
    y = jnp.dot(h.astype(cdt), wf_ref[...], preferred_element_type=jnp.float32)
    y = y + bf_ref[...]
    if not outermost_linear:
        y = _fast_sin(y)

    # TODO(synk): re-laying the (tile_p, P*out_f) result into a 128-lane-dense
    # slab in-kernel needs a cross-lane reshape that costs more than the
    # masked stores it saves in this compute-bound kernel, so it is skipped.
    o_ref[...] = y.astype(o_ref.dtype)


def _default_pack_lanes():
    # 256 matches the 2x256x256 MXU of v6e / v7x; 128 matches v5e's 4x128x128
    # MXUs and is the safe fallback for anything unrecognized.
    try:
        kind = jax.devices()[0].device_kind.lower()
    except Exception:
        return 128
    return 256 if any(t in kind for t in ("v6", "v7", "7x")) else 128


def siren_forward(coords, params, *, first_omega_0, hidden_omega_0,
                  outermost_linear, tile_n=16384, pack_lanes=None,
                  mxu_bf16=True):
    """Runs the full Siren MLP in a single fused Pallas kernel, tiled over rows.

    tile_n:     logical coordinate rows per grid step (clamped so the grid has
                >= 2 parallel steps whenever possible - keeps both v7x cores busy).
    pack_lanes: lane width activations are packed to (None = per-chip default:
                256 on v6e/v7x, 128 otherwise).
    mxu_bf16:   cast hidden/final matmul operands to bf16 (f32 accumulation);
                first layer, bias adds and sines stay f32.
    Returns (output, coords), matching the PyTorch module's forward().
    """
    w0, b0, wh, bh, wf, bf = params
    N, in_f = coords.shape
    hidden_layers = wh.shape[0]
    hidden_f = w0.shape[1]
    out_f = wf.shape[1]
    dtype = coords.dtype

    if pack_lanes is None:
        pack_lanes = _default_pack_lanes()

    # --- pad hidden width to a divisor of pack_lanes (or a 128-multiple if it
    # is already >= pack_lanes) so activations always fill vreg lanes.  Extra
    # units get zero weights/biases -> identical numerics on the real units.
    if hidden_f >= pack_lanes:
        hidden_p = _round_up(hidden_f, 128)
        P = 1
    else:
        hidden_p = hidden_f if pack_lanes % hidden_f == 0 else _next_pow2(hidden_f)
        P = pack_lanes // hidden_p
    if hidden_p != hidden_f:
        pad = hidden_p - hidden_f
        w0 = jnp.pad(w0, ((0, 0), (0, pad)))
        b0 = jnp.pad(b0, ((0, 0), (0, pad)))
        wh = jnp.pad(wh, ((0, 0), (0, pad), (0, pad)))
        bh = jnp.pad(bh, ((0, 0), (0, 0), (0, pad)))
        wf = jnp.pad(wf, ((0, pad), (0, 0)))

    # --- fold omega into weights / biases (exact rewrite, done once here).
    w0s, b0s = first_omega_0 * w0, first_omega_0 * b0
    whs, bhs = hidden_omega_0 * wh, hidden_omega_0 * bh
    if outermost_linear:
        wfs, bfs = wf, bf
    else:
        wfs, bfs = hidden_omega_0 * wf, hidden_omega_0 * bf

    w_dt = jnp.bfloat16 if mxu_bf16 else dtype

    # --- block-diagonal / lane-tiled packed weight layout (pure relayout).
    eye = jnp.eye(P, dtype=dtype)
    w0p = jnp.kron(eye, w0s)                                   # (P*in_f, P*H)
    b0p = jnp.tile(b0s, (1, P))                                # (1, P*H)
    if hidden_layers > 0:
        whp = jnp.stack([jnp.kron(eye, whs[l]) for l in range(hidden_layers)], 0)
        bhp = jnp.tile(bhs, (1, 1, P))                         # (L, 1, P*H)
    else:
        # dummy single block so the BlockSpec has a nonzero leading dim; the
        # kernel's unrolled loop never reads it.
        whp = jnp.zeros((1, P * hidden_p, P * hidden_p), dtype)
        bhp = jnp.zeros((1, 1, P * hidden_p), dtype)
    wfp = jnp.kron(eye, wfs)                                   # (P*H, P*out_f)
    bfp = jnp.tile(bfs, (1, P))                                # (1, P*out_f)
    whp = whp.astype(w_dt)
    wfp = wfp.astype(w_dt)

    L_blk = max(hidden_layers, 1)
    Hp, Op, Ip = P * hidden_p, P * out_f, P * in_f

    # --- row tiling: packed tile rows must be a multiple of 8 sublanes; cap
    # the tile so the grid has >= 2 (parallel) steps whenever N allows it.
    align = 8 * P
    tile_cap = _round_up(N, align)                 # one-tile-covers-all size
    tile_n = min(max(tile_n, align), tile_cap)
    if tile_cap > align:                           # >= 2 tiles are possible
        tile_n = min(tile_n, _round_up((N + 1) // 2, align))
    tile_n = _round_up(tile_n, align)
    N_pad = _round_up(N, tile_n)

    x = coords
    if N_pad != N:
        x = jnp.pad(x, ((0, N_pad - N), (0, 0)))
    xp = x.reshape(N_pad // P, Ip)                 # row r = P consecutive coords
    tile_p = tile_n // P
    grid = (N_pad // tile_n,)

    kernel = functools.partial(
        _siren_kernel,
        hidden_layers=hidden_layers,
        outermost_linear=outermost_linear,
        mxu_bf16=mxu_bf16,
    )

    # Weights use constant index maps so they stay resident in VMEM across
    # grid steps; only the x / output tiles stream.
    outp = pl.pallas_call(
        kernel,
        out_shape=jax.ShapeDtypeStruct((N_pad // P, Op), dtype),
        grid_spec=pltpu.PrefetchScalarGridSpec(
            num_scalar_prefetch=0,
            grid=grid,
            in_specs=[
                pl.BlockSpec((tile_p, Ip), lambda i: (i, 0)),        # x tile
                pl.BlockSpec((Ip, Hp), lambda i: (0, 0)),            # W0 packed
                pl.BlockSpec((1, Hp), lambda i: (0, 0)),             # b0
                pl.BlockSpec((L_blk, Hp, Hp), lambda i: (0, 0, 0)),  # Wh stack
                pl.BlockSpec((L_blk, 1, Hp), lambda i: (0, 0, 0)),   # bh stack
                pl.BlockSpec((Hp, Op), lambda i: (0, 0)),            # Wf
                pl.BlockSpec((1, Op), lambda i: (0, 0)),             # bf
            ],
            out_specs=pl.BlockSpec((tile_p, Op), lambda i: (i, 0)),
        ),
        compiler_params=pltpu.CompilerParams(
            dimension_semantics=("parallel",),
            vmem_limit_bytes=48 * 1024 * 1024,
        ),
    )(xp, w0p, b0p, whp, bhp, wfp, bfp)

    # Un-pack: physical row r holds logical rows P*r .. P*r+P-1 (row-major).
    out = outp.reshape(N_pad, out_f)[:N]
    return out, coords


def init_siren_params(key, in_features, hidden_features, hidden_layers,
                      out_features, first_omega_0, hidden_omega_0):
    """Deterministic init matching the PyTorch SIREN init scheme (weights are
    stored transposed: (in, out))."""
    keys = jax.random.split(key, 2 * (hidden_layers + 2))
    ki = iter(keys)

    def uniform(k, shape, bound):
        return jax.random.uniform(k, shape, jnp.float32, -bound, bound)

    w0 = uniform(next(ki), (in_features, hidden_features), 1.0 / in_features)
    b0 = uniform(next(ki), (1, hidden_features), 1.0 / jnp.sqrt(in_features))

    wb = jnp.sqrt(6.0 / hidden_features) / hidden_omega_0
    bb = 1.0 / jnp.sqrt(hidden_features)
    if hidden_layers > 0:
        wh = jnp.stack([uniform(next(ki), (hidden_features, hidden_features), wb)
                        for _ in range(hidden_layers)], axis=0)
        bh = jnp.stack([uniform(next(ki), (1, hidden_features), bb)
                        for _ in range(hidden_layers)], axis=0)
    else:
        wh = jnp.zeros((0, hidden_features, hidden_features), jnp.float32)
        bh = jnp.zeros((0, 1, hidden_features), jnp.float32)

    wf = uniform(next(ki), (hidden_features, out_features), wb)
    bf = uniform(next(ki), (1, out_features), bb)
    return (w0, b0, wh, bh, wf, bf)


def siren_reference(coords, params, *, first_omega_0, hidden_omega_0,
                    outermost_linear, mxu_bf16=False):
    """Pure-JAX reference.  mxu_bf16=True mimics the kernel's reduced-precision
    hidden/final matmul operands (for apples-to-apples checking of that path)."""
    w0, b0, wh, bh, wf, bf = params

    def dot(a, b):
        if mxu_bf16:
            return jnp.dot(a.astype(jnp.bfloat16), b.astype(jnp.bfloat16),
                           preferred_element_type=jnp.float32)
        return a @ b

    h = jnp.sin(first_omega_0 * (coords @ w0 + b0))   # first layer always f32
    for l in range(wh.shape[0]):
        h = jnp.sin(dot(h, hidden_omega_0 * wh[l]) + hidden_omega_0 * bh[l])
    if outermost_linear:
        y = dot(h, wf) + bf
    else:
        y = jnp.sin(dot(h, hidden_omega_0 * wf) + hidden_omega_0 * bf)
    return y


if __name__ == "__main__":
    first_omega_0, hidden_omega_0 = 30.0, 30.0
    key = jax.random.PRNGKey(0)
    k_params, k_coords = jax.random.split(key)

    ok = True

    # Config 1: classic SIREN 2 -> 32 (x3 sine layers) -> 1 with a linear head.
    # Sizes exercise: tile-aligned, padding path, and a multi-tile case.
    in_f, hid_f, layers, out_f = 2, 32, 2, 1
    params = init_siren_params(k_params, in_f, hid_f, layers, out_f,
                               first_omega_0, hidden_omega_0)
    for N in (256, 300, 40000):
        coords = jax.random.uniform(jax.random.fold_in(k_coords, N),
                                    (N, in_f), jnp.float32, -1.0, 1.0)

        # Exact path (f32 MXU operands): strict check vs the plain reference.
        out32, coords_out = siren_forward(
            coords, params, first_omega_0=first_omega_0,
            hidden_omega_0=hidden_omega_0, outermost_linear=True,
            mxu_bf16=False)
        jax.block_until_ready(out32)
        ref32 = siren_reference(coords, params, first_omega_0=first_omega_0,
                                hidden_omega_0=hidden_omega_0,
                                outermost_linear=True, mxu_bf16=False)
        ok &= out32.shape == (N, out_f) and coords_out.shape == coords.shape
        ok &= bool(jnp.allclose(out32, ref32, atol=1e-4, rtol=1e-4))

        # Default path (bf16 hidden/final MXU operands, f32 accumulation):
        # check against the precision-matched reference.
        out16, _ = siren_forward(
            coords, params, first_omega_0=first_omega_0,
            hidden_omega_0=hidden_omega_0, outermost_linear=True)
        jax.block_until_ready(out16)
        ref16 = siren_reference(coords, params, first_omega_0=first_omega_0,
                                hidden_omega_0=hidden_omega_0,
                                outermost_linear=True, mxu_bf16=True)
        ok &= bool(jnp.allclose(out16, ref16, atol=5e-3, rtol=5e-3))

    # Config 2: sine output head (outermost_linear=False) -> exercises the
    # final _fast_sin path; f32 operands, strict check.
    params2 = init_siren_params(jax.random.fold_in(k_params, 1), 2, 32, 1, 1,
                                first_omega_0, hidden_omega_0)
    coords2 = jax.random.uniform(jax.random.fold_in(k_coords, 7),
                                 (256, 2), jnp.float32, -1.0, 1.0)
    out2, _ = siren_forward(coords2, params2, first_omega_0=first_omega_0,
                            hidden_omega_0=hidden_omega_0,
                            outermost_linear=False, mxu_bf16=False)
    jax.block_until_ready(out2)
    ref2 = siren_reference(coords2, params2, first_omega_0=first_omega_0,
                           hidden_omega_0=hidden_omega_0,
                           outermost_linear=False, mxu_bf16=False)
    ok &= bool(jnp.allclose(out2, ref2, atol=1e-4, rtol=1e-4))

    assert ok
    # TODO(synk): coords.clone().detach().requires_grad_(True) is autograd
    # bookkeeping with no forward-pass compute; we just return coords
    # alongside the output, matching the module's (output, coords) tuple.
    print("KERNEL_OK")
</pallas_src>

<mosaic_0001>
module attributes {stable_mosaic.version = 11 : i64} {
  func.func @_siren_kernel(%arg0: i32, %arg1: memref<32x8xf32, #tpu.memory_space<vmem>>, %arg2: memref<8x128xf32, #tpu.memory_space<vmem>>, %arg3: memref<1x128xf32, #tpu.memory_space<vmem>>, %arg4: memref<2x128x128xf32, #tpu.memory_space<vmem>>, %arg5: memref<2x1x128xf32, #tpu.memory_space<vmem>>, %arg6: memref<128x4xf32, #tpu.memory_space<vmem>>, %arg7: memref<1x4xf32, #tpu.memory_space<vmem>>, %arg8: memref<32x4xf32, #tpu.memory_space<vmem>>) attributes {dimension_semantics = [#tpu.dimension_semantics<parallel>], iteration_bounds = array<i64: 2>, scalar_prefetch = 0 : i64, scratch_operands = 0 : i64, tpu.core_type = #tpu.core_type<tc>, window_params = [{transform_indices = @transform_0, window_bounds = array<i64: 32, 8>}, {pipeline_mode = #tpu.pipeline_mode<synchronous>, transform_indices = @transform_1, window_bounds = array<i64: 8, 128>}, {pipeline_mode = #tpu.pipeline_mode<synchronous>, transform_indices = @transform_2, window_bounds = array<i64: 1, 128>}, {pipeline_mode = #tpu.pipeline_mode<synchronous>, transform_indices = @transform_3, window_bounds = array<i64: 2, 128, 128>}, {pipeline_mode = #tpu.pipeline_mode<synchronous>, transform_indices = @transform_4, window_bounds = array<i64: 2, 1, 128>}, {pipeline_mode = #tpu.pipeline_mode<synchronous>, transform_indices = @transform_5, window_bounds = array<i64: 128, 4>}, {pipeline_mode = #tpu.pipeline_mode<synchronous>, transform_indices = @transform_6, window_bounds = array<i64: 1, 4>}, {transform_indices = @transform_7, window_bounds = array<i64: 32, 4>}]} {
    %c0 = arith.constant 0 : index
    %c0_0 = arith.constant 0 : index
    %0 = vector.load %arg1[%c0, %c0_0] : memref<32x8xf32, #tpu.memory_space<vmem>>, vector<32x8xf32>
    %c0_1 = arith.constant 0 : index
    %c0_2 = arith.constant 0 : index
    %1 = vector.load %arg2[%c0_1, %c0_2] : memref<8x128xf32, #tpu.memory_space<vmem>>, vector<8x128xf32>
    %cst = arith.constant dense<0.000000e+00> : vector<32x128xf32>
    %2 = tpu.matmul %0, %1, %cst {dimension_numbers = #tpu.dot_dimension_numbers<[1], [0], [0], [1], [0, 0, 1, 1], [], []>} : vector<32x8xf32>, vector<8x128xf32>, vector<32x128xf32> -> vector<32x128xf32>
    %c0_3 = arith.constant 0 : index
    %c0_4 = arith.constant 0 : index
    %3 = vector.load %arg3[%c0_3, %c0_4] : memref<1x128xf32, #tpu.memory_space<vmem>>, vector<1x128xf32>
    %4 = vector.broadcast %3 : vector<1x128xf32> to vector<32x128xf32>
    %5 = arith.addf %2, %4 : vector<32x128xf32>
    %cst_5 = arith.constant 0.318309873 : f32
    %6 = vector.broadcast %cst_5 : f32 to vector<32x128xf32>
    %7 = arith.mulf %5, %6 : vector<32x128xf32>
    %cst_6 = arith.constant 5.000000e-01 : f32
    %8 = vector.broadcast %cst_6 : f32 to vector<32x128xf32>
    %9 = arith.addf %7, %8 : vector<32x128xf32>
    %10 = math.floor %9 : vector<32x128xf32>
    %cst_7 = arith.constant 3.140625 : f32
    %11 = vector.broadcast %cst_7 : f32 to vector<32x128xf32>
    %12 = arith.mulf %10, %11 : vector<32x128xf32>
    %13 = arith.subf %5, %12 : vector<32x128xf32>
    %cst_8 = arith.constant 9.67653584E-4 : f32
    %14 = vector.broadcast %cst_8 : f32 to vector<32x128xf32>
    %15 = arith.mulf %10, %14 : vector<32x128xf32>
    %16 = arith.subf %13, %15 : vector<32x128xf32>
    %cst_9 = arith.constant 5.000000e-01 : f32
    %17 = vector.broadcast %cst_9 : f32 to vector<32x128xf32>
    %18 = arith.mulf %17, %10 : vector<32x128xf32>
    %19 = math.floor %18 : vector<32x128xf32>
    %cst_10 = arith.constant 2.000000e+00 : f32
    %20 = vector.broadcast %cst_10 : f32 to vector<32x128xf32>
    %21 = arith.mulf %20, %19 : vector<32x128xf32>
    %22 = arith.subf %10, %21 : vector<32x128xf32>
    %cst_11 = arith.constant 2.000000e+00 : f32
    %23 = vector.broadcast %cst_11 : f32 to vector<32x128xf32>
    %24 = arith.mulf %23, %22 : vector<32x128xf32>
    %cst_12 = arith.constant 1.000000e+00 : f32
    %25 = vector.broadcast %cst_12 : f32 to vector<32x128xf32>
    %26 = arith.subf %25, %24 : vector<32x128xf32>
    %27 = arith.mulf %16, %16 : vector<32x128xf32>
    %cst_13 = arith.constant -2.50521079E-8 : f32
    %28 = vector.broadcast %cst_13 : f32 to vector<32x128xf32>
    %29 = arith.mulf %27, %28 : vector<32x128xf32>
    %cst_14 = arith.constant 2.75573188E-6 : f32
    %30 = vector.broadcast %cst_14 : f32 to vector<32x128xf32>
    %31 = arith.addf %30, %29 : vector<32x128xf32>
    %32 = arith.mulf %27, %31 : vector<32x128xf32>
    %cst_15 = arith.constant -1.98412701E-4 : f32
    %33 = vector.broadcast %cst_15 : f32 to vector<32x128xf32>
    %34 = arith.addf %33, %32 : vector<32x128xf32>
    %35 = arith.mulf %27, %34 : vector<32x128xf32>
    %cst_16 = arith.constant 0.00833333377 : f32
    %36 = vector.broadcast %cst_16 : f32 to vector<32x128xf32>
    %37 = arith.addf %36, %35 : vector<32x128xf32>
    %38 = arith.mulf %27, %37 : vector<32x128xf32>
    %cst_17 = arith.constant -0.166666672 : f32
    %39 = vector.broadcast %cst_17 : f32 to vector<32x128xf32>
    %40 = arith.addf %39, %38 : vector<32x128xf32>
    %41 = arith.mulf %27, %40 : vector<32x128xf32>
    %cst_18 = arith.constant 1.000000e+00 : f32
    %42 = vector.broadcast %cst_18 : f32 to vector<32x128xf32>
    %43 = arith.addf %42, %41 : vector<32x128xf32>
    %44 = arith.mulf %16, %43 : vector<32x128xf32>
    %45 = arith.mulf %26, %44 : vector<32x128xf32>
    %c0_19 = arith.constant 0 : index
    %c0_20 = arith.constant 0 : index
    %c0_21 = arith.constant 0 : index
    %46 = vector.load %arg4[%c0_19, %c0_20, %c0_21] : memref<2x128x128xf32, #tpu.memory_space<vmem>>, vector<1x128x128xf32>
    %47 = vector.shape_cast %46 : vector<1x128x128xf32> to vector<128x128xf32>
    %cst_22 = arith.constant dense<0.000000e+00> : vector<32x128xf32>
    %48 = tpu.matmul %45, %47, %cst_22 {dimension_numbers = #tpu.dot_dimension_numbers<[1], [0], [0], [1], [0, 0, 1, 1], [], []>} : vector<32x128xf32>, vector<128x128xf32>, vector<32x128xf32> -> vector<32x128xf32>
    %c0_23 = arith.constant 0 : index
    %c0_24 = arith.constant 0 : index
    %c0_25 = arith.constant 0 : index
    %49 = vector.load %arg5[%c0_23, %c0_24, %c0_25] : memref<2x1x128xf32, #tpu.memory_space<vmem>>, vector<1x1x128xf32>
    %50 = vector.shape_cast %49 : vector<1x1x128xf32> to vector<1x128xf32>
    %51 = vector.broadcast %50 : vector<1x128xf32> to vector<32x128xf32>
    %52 = arith.addf %48, %51 : vector<32x128xf32>
    %cst_26 = arith.constant 0.318309873 : f32
    %53 = vector.broadcast %cst_26 : f32 to vector<32x128xf32>
    %54 = arith.mulf %52, %53 : vector<32x128xf32>
    %cst_27 = arith.constant 5.000000e-01 : f32
    %55 = vector.broadcast %cst_27 : f32 to vector<32x128xf32>
    %56 = arith.addf %54, %55 : vector<32x128xf32>
    %57 = math.floor %56 : vector<32x128xf32>
    %cst_28 = arith.constant 3.140625 : f32
    %58 = vector.broadcast %cst_28 : f32 to vector<32x128xf32>
    %59 = arith.mulf %57, %58 : vector<32x128xf32>
    %60 = arith.subf %52, %59 : vector<32x128xf32>
    %cst_29 = arith.constant 9.67653584E-4 : f32
    %61 = vector.broadcast %cst_29 : f32 to vector<32x128xf32>
    %62 = arith.mulf %57, %61 : vector<32x128xf32>
    %63 = arith.subf %60, %62 : vector<32x128xf32>
    %cst_30 = arith.constant 5.000000e-01 : f32
    %64 = vector.broadcast %cst_30 : f32 to vector<32x128xf32>
    %65 = arith.mulf %64, %57 : vector<32x128xf32>
    %66 = math.floor %65 : vector<32x128xf32>
    %cst_31 = arith.constant 2.000000e+00 : f32
    %67 = vector.broadcast %cst_31 : f32 to vector<32x128xf32>
    %68 = arith.mulf %67, %66 : vector<32x128xf32>
    %69 = arith.subf %57, %68 : vector<32x128xf32>
    %cst_32 = arith.constant 2.000000e+00 : f32
    %70 = vector.broadcast %cst_32 : f32 to vector<32x128xf32>
    %71 = arith.mulf %70, %69 : vector<32x128xf32>
    %cst_33 = arith.constant 1.000000e+00 : f32
    %72 = vector.broadcast %cst_33 : f32 to vector<32x128xf32>
    %73 = arith.subf %72, %71 : vector<32x128xf32>
    %74 = arith.mulf %63, %63 : vector<32x128xf32>
    %cst_34 = arith.constant -2.50521079E-8 : f32
    %75 = vector.broadcast %cst_34 : f32 to vector<32x128xf32>
    %76 = arith.mulf %74, %75 : vector<32x128xf32>
    %cst_35 = arith.constant 2.75573188E-6 : f32
    %77 = vector.broadcast %cst_35 : f32 to vector<32x128xf32>
    %78 = arith.addf %77, %76 : vector<32x128xf32>
    %79 = arith.mulf %74, %78 : vector<32x128xf32>
    %cst_36 = arith.constant -1.98412701E-4 : f32
    %80 = vector.broadcast %cst_36 : f32 to vector<32x128xf32>
    %81 = arith.addf %80, %79 : vector<32x128xf32>
    %82 = arith.mulf %74, %81 : vector<32x128xf32>
    %cst_37 = arith.constant 0.00833333377 : f32
    %83 = vector.broadcast %cst_37 : f32 to vector<32x128xf32>
    %84 = arith.addf %83, %82 : vector<32x128xf32>
    %85 = arith.mulf %74, %84 : vector<32x128xf32>
    %cst_38 = arith.constant -0.166666672 : f32
    %86 = vector.broadcast %cst_38 : f32 to vector<32x128xf32>
    %87 = arith.addf %86, %85 : vector<32x128xf32>
    %88 = arith.mulf %74, %87 : vector<32x128xf32>
    %cst_39 = arith.constant 1.000000e+00 : f32
    %89 = vector.broadcast %cst_39 : f32 to vector<32x128xf32>
    %90 = arith.addf %89, %88 : vector<32x128xf32>
    %91 = arith.mulf %63, %90 : vector<32x128xf32>
    %92 = arith.mulf %73, %91 : vector<32x128xf32>
    %c1 = arith.constant 1 : index
    %c0_40 = arith.constant 0 : index
    %c0_41 = arith.constant 0 : index
    %93 = vector.load %arg4[%c1, %c0_40, %c0_41] : memref<2x128x128xf32, #tpu.memory_space<vmem>>, vector<1x128x128xf32>
    %94 = vector.shape_cast %93 : vector<1x128x128xf32> to vector<128x128xf32>
    %cst_42 = arith.constant dense<0.000000e+00> : vector<32x128xf32>
    %95 = tpu.matmul %92, %94, %cst_42 {dimension_numbers = #tpu.dot_dimension_numbers<[1], [0], [0], [1], [0, 0, 1, 1], [], []>} : vector<32x128xf32>, vector<128x128xf32>, vector<32x128xf32> -> vector<32x128xf32>
    %c1_43 = arith.constant 1 : index
    %c0_44 = arith.constant 0 : index
    %c0_45 = arith.constant 0 : index
    %96 = vector.load %arg5[%c1_43, %c0_44, %c0_45] : memref<2x1x128xf32, #tpu.memory_space<vmem>>, vector<1x1x128xf32>
    %97 = vector.shape_cast %96 : vector<1x1x128xf32> to vector<1x128xf32>
    %98 = vector.broadcast %97 : vector<1x128xf32> to vector<32x128xf32>
    %99 = arith.addf %95, %98 : vector<32x128xf32>
    %cst_46 = arith.constant 0.318309873 : f32
    %100 = vector.broadcast %cst_46 : f32 to vector<32x128xf32>
    %101 = arith.mulf %99, %100 : vector<32x128xf32>
    %cst_47 = arith.constant 5.000000e-01 : f32
    %102 = vector.broadcast %cst_47 : f32 to vector<32x128xf32>
    %103 = arith.addf %101, %102 : vector<32x128xf32>
    %104 = math.floor %103 : vector<32x128xf32>
    %cst_48 = arith.constant 3.140625 : f32
    %105 = vector.broadcast %cst_48 : f32 to vector<32x128xf32>
    %106 = arith.mulf %104, %105 : vector<32x128xf32>
    %107 = arith.subf %99, %106 : vector<32x128xf32>
    %cst_49 = arith.constant 9.67653584E-4 : f32
    %108 = vector.broadcast %cst_49 : f32 to vector<32x128xf32>
    %109 = arith.mulf %104, %108 : vector<32x128xf32>
    %110 = arith.subf %107, %109 : vector<32x128xf32>
    %cst_50 = arith.constant 5.000000e-01 : f32
    %111 = vector.broadcast %cst_50 : f32 to vector<32x128xf32>
    %112 = arith.mulf %111, %104 : vector<32x128xf32>
    %113 = math.floor %112 : vector<32x128xf32>
    %cst_51 = arith.constant 2.000000e+00 : f32
    %114 = vector.broadcast %cst_51 : f32 to vector<32x128xf32>
    %115 = arith.mulf %114, %113 : vector<32x128xf32>
    %116 = arith.subf %104, %115 : vector<32x128xf32>
    %cst_52 = arith.constant 2.000000e+00 : f32
    %117 = vector.broadcast %cst_52 : f32 to vector<32x128xf32>
    %118 = arith.mulf %117, %116 : vector<32x128xf32>
    %cst_53 = arith.constant 1.000000e+00 : f32
    %119 = vector.broadcast %cst_53 : f32 to vector<32x128xf32>
    %120 = arith.subf %119, %118 : vector<32x128xf32>
    %121 = arith.mulf %110, %110 : vector<32x128xf32>
    %cst_54 = arith.constant -2.50521079E-8 : f32
    %122 = vector.broadcast %cst_54 : f32 to vector<32x128xf32>
    %123 = arith.mulf %121, %122 : vector<32x128xf32>
    %cst_55 = arith.constant 2.75573188E-6 : f32
    %124 = vector.broadcast %cst_55 : f32 to vector<32x128xf32>
    %125 = arith.addf %124, %123 : vector<32x128xf32>
    %126 = arith.mulf %121, %125 : vector<32x128xf32>
    %cst_56 = arith.constant -1.98412701E-4 : f32
    %127 = vector.broadcast %cst_56 : f32 to vector<32x128xf32>
    %128 = arith.addf %127, %126 : vector<32x128xf32>
    %129 = arith.mulf %121, %128 : vector<32x128xf32>
    %cst_57 = arith.constant 0.00833333377 : f32
    %130 = vector.broadcast %cst_57 : f32 to vector<32x128xf32>
    %131 = arith.addf %130, %129 : vector<32x128xf32>
    %132 = arith.mulf %121, %131 : vector<32x128xf32>
    %cst_58 = arith.constant -0.166666672 : f32
    %133 = vector.broadcast %cst_58 : f32 to vector<32x128xf32>
    %134 = arith.addf %133, %132 : vector<32x128xf32>
    %135 = arith.mulf %121, %134 : vector<32x128xf32>
    %cst_59 = arith.constant 1.000000e+00 : f32
    %136 = vector.broadcast %cst_59 : f32 to vector<32x128xf32>
    %137 = arith.addf %136, %135 : vector<32x128xf32>
    %138 = arith.mulf %110, %137 : vector<32x128xf32>
    %139 = arith.mulf %120, %138 : vector<32x128xf32>
    %c0_60 = arith.constant 0 : index
    %c0_61 = arith.constant 0 : index
    %140 = vector.load %arg6[%c0_60, %c0_61] : memref<128x4xf32, #tpu.memory_space<vmem>>, vector<128x4xf32>
    %cst_62 = arith.constant dense<0.000000e+00> : vector<32x4xf32>
    %141 = tpu.matmul %139, %140, %cst_62 {dimension_numbers = #tpu.dot_dimension_numbers<[1], [0], [0], [1], [0, 0, 1, 1], [], []>} : vector<32x128xf32>, vector<128x4xf32>, vector<32x4xf32> -> vector<32x4xf32>
    %c0_63 = arith.constant 0 : index
    %c0_64 = arith.constant 0 : index
    %142 = vector.load %arg7[%c0_63, %c0_64] : memref<1x4xf32, #tpu.memory_space<vmem>>, vector<1x4xf32>
    %143 = vector.broadcast %142 : vector<1x4xf32> to vector<32x4xf32>
    %144 = arith.addf %141, %143 : vector<32x4xf32>
    %c0_65 = arith.constant 0 : index
    %c0_66 = arith.constant 0 : index
    %145 = vector.load %arg8[%c0_65, %c0_66] : memref<32x4xf32, #tpu.memory_space<vmem>>, vector<32x4xf32>
    tpu.vector_store %arg8[%c0_65, %c0_66], %144 {strides = array<i32>} : memref<32x4xf32, #tpu.memory_space<vmem>>, vector<32x4xf32>,
    return
  }
  func.func @transform_0(%arg0: i32) -> (i32, i32) {
    %c0_i32 = arith.constant 0 : i32
    %c0_i32_0 = arith.constant 0 : i32
    return %arg0, %c0_i32 : i32, i32
  }
  func.func @transform_1(%arg0: i32) -> (i32, i32) {
    %c0_i32 = arith.constant 0 : i32
    %c0_i32_0 = arith.constant 0 : i32
    %c0_i32_1 = arith.constant 0 : i32
    return %c0_i32, %c0_i32_0 : i32, i32
  }
  func.func @transform_2(%arg0: i32) -> (i32, i32) {
    %c0_i32 = arith.constant 0 : i32
    %c0_i32_0 = arith.constant 0 : i32
    %c0_i32_1 = arith.constant 0 : i32
    return %c0_i32, %c0_i32_0 : i32, i32
  }
  func.func @transform_3(%arg0: i32) -> (i32, i32, i32) {
    %c0_i32 = arith.constant 0 : i32
    %c0_i32_0 = arith.constant 0 : i32
    %c0_i32_1 = arith.constant 0 : i32
    %c0_i32_2 = arith.constant 0 : i32
    return %c0_i32, %c0_i32_0, %c0_i32_1 : i32, i32, i32
  }
  func.func @transform_4(%arg0: i32) -> (i32, i32, i32) {
    %c0_i32 = arith.constant 0 : i32
    %c0_i32_0 = arith.constant 0 : i32
    %c0_i32_1 = arith.constant 0 : i32
    %c0_i32_2 = arith.constant 0 : i32
    return %c0_i32, %c0_i32_0, %c0_i32_1 : i32, i32, i32
  }
  func.func @transform_5(%arg0: i32) -> (i32, i32) {
    %c0_i32 = arith.constant 0 : i32
    %c0_i32_0 = arith.constant 0 : i32
    %c0_i32_1 = arith.constant 0 : i32
    return %c0_i32, %c0_i32_0 : i32, i32
  }
  func.func @transform_6(%arg0: i32) -> (i32, i32) {
    %c0_i32 = arith.constant 0 : i32
    %c0_i32_0 = arith.constant 0 : i32
    %c0_i32_1 = arith.constant 0 : i32
    return %c0_i32, %c0_i32_0 : i32, i32
  }
  func.func @transform_7(%arg0: i32) -> (i32, i32) {
    %c0_i32 = arith.constant 0 : i32
    %c0_i32_0 = arith.constant 0 : i32
    return %arg0, %c0_i32 : i32, i32
  }
}

</mosaic_0001>

<bundles_post_ra>
// kernel: tpu_custom_call.1
= control target key start
LH: loop header
LB: loop body
LE: loop exit
PB: predicated region body
PF: predicated region fallthrough
CT: control target
= control target key end

     0   :  { %12 = vsyncpa [#allocation3], 0  ;;  %s1543_s24 = smov 0   ;;  %s1804_s0 = inlined_call_operand.vmem [shape: f32[64,8], index: 0, kind: input, shape index: {}]   ;;  %s1805_s1 = inlined_call_operand.vmem [shape: f32[8,128], index: 1, kind: input, shape index: {}]   ;;  %s1806_s2 = inlined_call_operand.vmem [shape: f32[1,128], index: 2, kind: input, shape index: {}]   ;;  %s1807_s3 = inlined_call_operand.hbm [shape: f32[2,128,128], index: 3, kind: input, shape index: {}]   ;;  %s1808_s4 = inlined_call_operand.vmem [shape: f32[2,1,128], index: 4, kind: input, shape index: {}]   ;;  %s1809_s5 = inlined_call_operand.vmem [shape: f32[128,4], index: 5, kind: input, shape index: {}]   ;;  %s1810_s6 = inlined_call_operand.vmem [shape: f32[1,4], index: 6, kind: input, shape index: {}]   ;;  %s1811_s7 = inlined_call_operand.vmem [shape: f32[64,4], index: 7, kind: output, shape index: {}]  }
   0x1 LB: > { %s1118_s25 = sadd.s32 4294967295, %s1498_s24   ;;  %p1120_p0 = scmp.ge.s32.totalorder %s1498_s24, 1  ;;  %s1498_s24 = sphi %s1543_s24, %s18_s24  }
   0x2   : > { %p201_p1 = scmp.lt.s32.totalorder %s1498_s24, 3  ;;  %s1500_s26 = smov [#allocation2]  }
   0x3   : > { %s219_s27 = sshll.u32 %s1500_s26, 4  ;;  %p1557_p3 = scmp.eq.s32.totalorder %s1118_s25, 0  ;;  %s220_s27 = int_to_ptr.vmem [resolvable:$true] %s219_s27 }
   0x4   : > { %p1551_p2 = pnand %p1120_p0, %p201_p1  ;;  %s1460_s10 = scalar_lea.hbm %s1807_s3, 4096 }
   0x5   : > { %s1816_s29 = scalar_select %p1557_p3, 1, 0 }
   0x6   : > { %s1815_s28 = scalar_select %p1551_p2, 1, 0 }
   0x7   : > { %p1443_p4 = pneg %p1551_p2  ;;  %p1461_p6 = scmp.ne.s32.totalorder %s1807_s3, %s1460_s10 }
   0x8   : > { %p1467_p10 = scmp.lt.u32.totalorder %s1460_s10, %s1807_s3 }
   0x9   : > { %p1565_p5 = pnand %p1557_p3, %p1443_p4 }
   0xb   : > { %p1462_p7 = pneg %p1565_p5 }
   0xd   : > { %p1463_p8 = pnand %p1462_p7, %p1461_p6 }
   0xf   : > { %p1464_p9 = pneg %p1463_p8 }
  0x11   : > { %p1469_p11 = pnand %p1467_p10, %p1464_p9 }
  0x13   : > { %1472 = shalt.err (!%p1469_p11)
}
  0x14   : > { %s1473_s15 = scalar_lea.vmem %s220_s27, 4096  ;;  %p1481_p1 = scmp.lt.s32.totalorder %s220_s27, %s220_s27 }
  0x15   : > { %p1474_p12 = scmp.ne.s32.totalorder %s220_s27, %s1473_s15  ;;  %p1482_p4 = scmp.lt.s32.totalorder %s1473_s15, %s1473_s15 }
  0x17   : > { %p1476_p13 = pnand %p1474_p12, %p1462_p7  ;;  %p1483_p3 = por %p1482_p4, %p1481_p1 }
  0x19   : > { %p1477_p0 = pneg %p1476_p13 }
  0x1b   : > { %p1484_p2 = pnand %p1483_p3, %p1477_p0 }
  0x1d   : > { %1487 = shalt.err (!%p1484_p2)
}
  0x1e   : > { %s1501_s16 = smov 128   ;;  %s1502_s17 = smov 8  }
  0x1f   : > { %1446 = dma.hbm_to_vmem [thread:$0]  (!%p1565_p5), %s1807_s3, 4096, %s220_s27, [#allocation3], %s1501_s16, %s1501_s16, %s1502_s17  }
  0x20   : > { %p1818_p6 = scmp.ne.s32.totalorder %s1815_s28, 0 }
  0x21   : > { %p1819_p8 = scmp.ne.s32.totalorder (!%p1818_p6), %s1816_s29, 0 }
  0x22   : > { %253 = sbr.rel (%p1818_p6) target bundleno = 1032 (0x408), region = 48 }
  0x29   : > { %1493 = dma.done.wait (%p1819_p8), [#allocation3], 4096  }
  0x2a   : > { %1495 = vsyncadd (%p1819_p8), [#allocation3], 4294963200  ;;  %s1125_s20 = sshll.u32 %s1118_s25, 2  ;;  %vm309_vm0 = vcmask 64512   ;;  %v301_v0 = vld [vmem:[%s1805_s1] sm:$0xff]  ;;  %v512_v6 = vld [vmem:[#allocation2 + $0x8] sm:$0xff] }
  0x2b   : > { %p286_p2 = scmp.lt.s32.totalorder %s1125_s20, 7  ;;  %1205 = vmatprep.subr.mxu0 %v301_v0  ;;  %v511_v5 = vld [vmem:[#allocation2] sm:$0xff]  ;;  %v513_v8 = vld [vmem:[#allocation2 + $0x10] sm:$0xff]  ;;  %v514_v9 = vld [vmem:[#allocation2 + $0x18] sm:$0xff]  ;;  %vm1045_vm1 = vcmask 31744  }
  0x2c   : > { %1206 = vmatpush3.msra.mxu0 %v301_v0  ;;  %v1327_v7 = vpack.c.bf16 %v512_v6, %v511_v5  ;;  %v1331_v10 = vpack.c.bf16 %v514_v9, %v513_v8  ;;  %v515_v11 = vld [vmem:[#allocation2 + $0x20] sm:$0xff]  ;;  %v516_v12 = vld [vmem:[#allocation2 + $0x28] sm:$0xff]  ;;  %v517_v14 = vld [vmem:[#allocation2 + $0x30] sm:$0xff] }
  0x2d   : > { %s1821_s20 = smov (!%p286_p2, %s1125_s20), 7  ;;  %v1335_v13 = vpack.c.bf16 %v516_v12, %v515_v11  ;;  %v518_v15 = vld [vmem:[#allocation2 + $0x38] sm:$0xff]  ;;  %v519_v16 = vld [vmem:[#allocation2 + $0x40] sm:$0xff]  ;;  %v520_v18 = vld [vmem:[#allocation2 + $0x48] sm:$0xff] }
  0x2e   : > { %s1126_s21 = sshll.u32 %s1821_s20, 3  ;;  %1328 = vmatprep.subr.bf16.mxu1 %v1327_v7  ;;  %v1339_v17 = vpack.c.bf16 %v518_v15, %v517_v14  ;;  %v1343_v19 = vpack.c.bf16 %v520_v18, %v519_v16  ;;  %v521_v20 = vld [vmem:[#allocation2 + $0x50] sm:$0xff]  ;;  %v522_v21 = vld [vmem:[#allocation2 + $0x58] sm:$0xff]  ;;  %v523_v23 = vld [vmem:[#allocation2 + $0x60] sm:$0xff] }
  0x2f   : > { %s289_s26 = scalar_lea.vmem %s1804_s0, %s1126_s21  ;;  %1330 = vmatpush3.bf16.msra.mxu1 %v1327_v7  ;;  %v1347_v22 = vpack.c.bf16 %v522_v21, %v521_v20  ;;  %v524_v24 = vld [vmem:[#allocation2 + $0x68] sm:$0xff]  ;;  %v525_v26 = vld [vmem:[#allocation2 + $0x70] sm:$0xff]  ;;  %v526_v27 = vld [vmem:[#allocation2 + $0x78] sm:$0xff]  ;;  %s295_s30 = scalar_lea.vmem %s1811_s7, %s1126_s21 }
  0x30   : > { %v297_v1 = vld [vmem:[%s289_s26] sm:$0xff]  ;;  %v298_v2 = vld [vmem:[%s289_s26 + $0x8] sm:$0xff]  ;;  %v299_v3 = vld [vmem:[%s289_s26 + $0x10] sm:$0xff]  ;;  %1332 = vmatprep.subr.bf16.mxu1 %v1331_v10  ;;  %v1351_v25 = vpack.c.bf16 %v524_v24, %v523_v23  ;;  %v1355_v28 = vpack.c.bf16 %v526_v27, %v525_v26 }
  0x31   : > { %1207 = vmatprep.mubr.msk.f32.mxu0 %vm309_vm0, %v297_v1  ;;  %v300_v4 = vld [vmem:[%s289_s26 + $0x18] sm:$0xff]  ;;  %v1129_v29 = vld [vmem:[%s1806_s2] ss:$0 sm:$0xff] }
  0x32   : > { %1208 = vmatmul.mubr.msk.f32.vlgmr.msra.gmra.mrb[0].mxu0 %vm309_vm0, %v298_v2 }
  0x33   : > { %1210 = vmatprep.mubr.msk.f32.mxu0 %vm309_vm0, %v299_v3  ;;  %1334 = vmatpush3.bf16.msra.mxu1 %v1331_v10 }
  0x34   : > { %1336 = vmatprep.subr.bf16.mxu1 %v1335_v13 }
  0x36   : > { %1211 = vmatmul.mubr.msk.f32.gmra.mrb[2].mxu0 %vm309_vm0, %v300_v4 }
  0x37   : > { %1338 = vmatpush3.bf16.msra.mxu1 %v1335_v13 }
  0x38   : > { %1340 = vmatprep.subr.bf16.mxu1 %v1339_v17 }
  0x3b   : > { %1342 = vmatpush3.bf16.msra.mxu1 %v1339_v17 }
  0x3c   : > { %1344 = vmatprep.subr.bf16.mxu1 %v1343_v19 }
  0x3f   : > { %1346 = vmatpush3.bf16.msra.mxu1 %v1343_v19 }
  0x40   : > { %1348 = vmatprep.subr.bf16.mxu1 %v1347_v22 }
  0x43   : > { %1350 = vmatpush3.bf16.msra.mxu1 %v1347_v22 }
  0x44   : > { %1352 = vmatprep.subr.bf16.mxu1 %v1351_v25 }
  0x47   : > { %1354 = vmatpush3.bf16.msra.mxu1 %v1351_v25 }
  0x48   : > { %1356 = vmatprep.subr.bf16.mxu1 %v1355_v28 }
  0x4b   : > { %1358 = vmatpush3.bf16.msra.mxu1 %v1355_v28 }
 0x105   : > { %v1209_v30 = vpop.f32.mrb[0].mxu0 }
 0x106   : > { %v394_v31 = vadd.f32 %v1209_v30, %v1129_v29  ;;  %v388_v32 = vpop.f32.mrb[1].mxu0 }
 0x107   : > { %v389_v33 = vadd.f32 %v1129_v29, %v388_v32 }
 0x108   : > { %v408_v34 = vmul.f32 0.31830987, %v394_v31 }
 0x109   : > { %v407_v35 = vmul.f32 0.31830987, %v389_v33  ;;  %v1212_v36 = vpop.f32.mrb[2].mxu0 }
 0x10a   : > { %v412_v37 = vadd.f32 0.5, %v408_v34  ;;  %v404_v38 = vadd.f32 %v1212_v36, %v1129_v29  ;;  %v398_v39 = vpop.f32.mrb[3].mxu0 }
 0x10b   : > { %v411_v40 = vadd.f32 0.5, %v407_v35  ;;  %v399_v41 = vadd.f32 %v1129_v29, %v398_v39 }
 0x10c   : > { %v1607_v42 = vfloor.f32 %v412_v37  ;;  %v410_v43 = vmul.f32 0.31830987, %v404_v38 }
 0x10d   : > { %v1609_v44 = vfloor.f32 %v411_v40  ;;  %v409_v45 = vmul.f32 0.31830987, %v399_v41 }
 0x10e   : > { %v420_v46 = vmul.f32 3.140625, %v1607_v42  ;;  %v414_v47 = vadd.f32 0.5, %v410_v43  ;;  %v428_v51 = vmul.f32 0.0009676536, %v1607_v42  ;;  %v436_v8 = vmul.f32 0.5, %v1607_v42 }
 0x10f   : > { %v419_v48 = vmul.f32 3.140625, %v1609_v44  ;;  %v413_v49 = vadd.f32 0.5, %v409_v45  ;;  %v427_v55 = vmul.f32 0.0009676536, %v1609_v44  ;;  %v435_v5 = vmul.f32 0.5, %v1609_v44 }
 0x110   : > { %v424_v50 = vsub.f32 %v394_v31, %v420_v46  ;;  %v1614_v52 = vfloor.f32 %v414_v47  ;;  %v440_v18 = vfloor.f32 %v436_v8 }
 0x111   : > { %v423_v53 = vsub.f32 %v389_v33, %v419_v48  ;;  %v1616_v54 = vfloor.f32 %v413_v49  ;;  %v439_v14 = vfloor.f32 %v435_v5 }
 0x112   : > { %v1619_v56 = vsub.f32 %v424_v50, %v428_v51  ;;  %v422_v57 = vmul.f32 3.140625, %v1614_v52  ;;  %v430_v62 = vmul.f32 0.0009676536, %v1614_v52  ;;  %v438_v20 = vmul.f32 0.5, %v1614_v52 }
 0x113   : > { %v421_v58 = vmul.f32 3.140625, %v1616_v54  ;;  %v1623_v59 = vsub.f32 %v423_v53, %v427_v55  ;;  %v429_v0 = vmul.f32 0.0009676536, %v1616_v54  ;;  %v437_v16 = vmul.f32 0.5, %v1616_v54 }
 0x114   : > { %v460_v60 = vmul.f32 %v1619_v56, %v1619_v56  ;;  %v426_v61 = vsub.f32 %v404_v38, %v422_v57  ;;  %v443_v26 = vmul.f32 2.0, %v439_v14  ;;  %v444_v30 = vmul.f32 2.0, %v440_v18 }
 0x115   : > { %v425_v63 = vsub.f32 %v399_v41, %v421_v58  ;;  %v459_v1 = vmul.f32 %v1623_v59, %v1623_v59  ;;  %v441_v28 = vfloor.f32 %v437_v16  ;;  %v442_v32 = vfloor.f32 %v438_v20  ;;  %v727_v20 = vld [vmem:[#allocation2 + $0x98] sm:$0xff] }
 0x116   : > { %v1631_v2 = vsub.f32 %v426_v61, %v430_v62  ;;  %v464_v3 = vmul.f32 -2.5052108e-08, %v460_v60  ;;  %v447_v38 = vsub.f32 %v1609_v44, %v443_v26  ;;  %v448_v43 = vsub.f32 %v1607_v42, %v444_v30  ;;  %v732_v26 = vld [vmem:[#allocation2 + $0xc0] sm:$0xff]  ;;  %v735_v30 = vld [vmem:[#allocation2 + $0xd8] sm:$0xff] }
 0x117   : > { %v1633_v4 = vsub.f32 %v425_v63, %v429_v0  ;;  %v463_v6 = vmul.f32 -2.5052108e-08, %v459_v1  ;;  %v445_v40 = vmul.f32 2.0, %v441_v28  ;;  %v446_v46 = vmul.f32 2.0, %v442_v32  ;;  %v736_v32 = vld [vmem:[#allocation2 + $0xe0] sm:$0xff] }
 0x118   : > { %v462_v7 = vmul.f32 %v1631_v2, %v1631_v2  ;;  %v468_v9 = vadd.f32 2.7557319e-06, %v464_v3  ;;  %v451_v53 = vmul.f32 2.0, %v447_v38  ;;  %v452_v61 = vmul.f32 2.0, %v448_v43  ;;  %v1134_v38 = vld [vmem:[%s1808_s4] ss:$0 sm:$0xff] }
 0x119   : > { %v461_v10 = vmul.f32 %v1633_v4, %v1633_v4  ;;  %v467_v11 = vadd.f32 2.7557319e-06, %v463_v6  ;;  %v449_v57 = vsub.f32 %v1616_v54, %v445_v40  ;;  %v450_v44 = vsub.f32 %v1614_v52, %v446_v46 }
 0x11a   : > { %v472_v12 = vmul.f32 %v468_v9, %v460_v60  ;;  %v466_v13 = vmul.f32 -2.5052108e-08, %v462_v7  ;;  %v455_v6 = vsub.f32 1.0, %v451_v53 }
 0x11b   : > { %v471_v15 = vmul.f32 %v467_v11, %v459_v1  ;;  %v465_v17 = vmul.f32 -2.5052108e-08, %v461_v10  ;;  %v456_v11 = vsub.f32 1.0, %v452_v61 }
 0x11c   : > { %v476_v19 = vadd.f32 -0.0001984127, %v472_v12  ;;  %v470_v21 = vadd.f32 2.7557319e-06, %v466_v13 }
 0x11d   : > { %v475_v22 = vadd.f32 -0.0001984127, %v471_v15  ;;  %v469_v23 = vadd.f32 2.7557319e-06, %v465_v17 }
 0x11e   : > { %v480_v24 = vmul.f32 %v476_v19, %v460_v60  ;;  %v474_v25 = vmul.f32 %v470_v21, %v462_v7  ;;  %v726_v19 = vld [vmem:[#allocation2 + $0x90] sm:$0xff] }
 0x11f   : > { %v479_v27 = vmul.f32 %v475_v22, %v459_v1  ;;  %v473_v29 = vmul.f32 %v469_v23, %v461_v10  ;;  %v1363_v21 = vpack.c.bf16 %v727_v20, %v726_v19  ;;  %v729_v22 = vld [vmem:[#allocation2 + $0xa8] sm:$0xff] }
 0x120   : > { %v484_v31 = vadd.f32 0.008333334, %v480_v24  ;;  %v478_v33 = vadd.f32 -0.0001984127, %v474_v25  ;;  %v731_v24 = vld [vmem:[#allocation2 + $0xb8] sm:$0xff] }
 0x121   : > { %v483_v34 = vadd.f32 0.008333334, %v479_v27  ;;  %v477_v35 = vadd.f32 -0.0001984127, %v473_v29  ;;  %v733_v27 = vld [vmem:[#allocation2 + $0xc8] sm:$0xff]  ;;  %v734_v29 = vld [vmem:[#allocation2 + $0xd0] sm:$0xff] }
 0x122   : > { %v488_v36 = vmul.f32 %v484_v31, %v460_v60  ;;  %v482_v37 = vmul.f32 %v478_v33, %v462_v7  ;;  %v1375_v28 = vpack.c.bf16 %v733_v27, %v732_v26  ;;  %v1379_v31 = vpack.c.bf16 %v735_v30, %v734_v29  ;;  %v737_v33 = vld [vmem:[#allocation2 + $0xe8] sm:$0xff] }
 0x123   : > { %v487_v39 = vmul.f32 %v483_v34, %v459_v1  ;;  %v481_v41 = vmul.f32 %v477_v35, %v461_v10  ;;  %v1383_v34 = vpack.c.bf16 %v737_v33, %v736_v32  ;;  %v738_v35 = vld [vmem:[#allocation2 + $0xf0] sm:$0xff] }
 0x124   : > { %v492_v45 = vadd.f32 -0.16666667, %v488_v36  ;;  %v486_v47 = vadd.f32 0.008333334, %v482_v37  ;;  %v739_v36 = vld [vmem:[#allocation2 + $0xf8] sm:$0xff] }
 0x125   : > { %v491_v48 = vadd.f32 -0.16666667, %v487_v39  ;;  %v485_v49 = vadd.f32 0.008333334, %v481_v41  ;;  %v1387_v37 = vpack.c.bf16 %v739_v36, %v738_v35 }
 0x126   : > { %v496_v50 = vmul.f32 %v492_v45, %v460_v60  ;;  %v490_v51 = vmul.f32 %v486_v47, %v462_v7  ;;  %v453_v60 = vmul.f32 2.0, %v449_v57 }
 0x127   : > { %v495_v55 = vmul.f32 %v491_v48, %v459_v1  ;;  %v489_v58 = vmul.f32 %v485_v49, %v461_v10  ;;  %v454_v1 = vmul.f32 2.0, %v450_v44 }
 0x128   : > { %v500_v62 = vadd.f32 1.0, %v496_v50  ;;  %v494_v63 = vadd.f32 -0.16666667, %v490_v51  ;;  %v457_v52 = vsub.f32 1.0, %v453_v60 }
 0x129   : > { %v499_v0 = vadd.f32 1.0, %v495_v55  ;;  %v493_v3 = vadd.f32 -0.16666667, %v489_v58 }
 0x12a   : > { %v504_v42 = vmul.f32 %v500_v62, %v1619_v56  ;;  %v498_v5 = vmul.f32 %v494_v63, %v462_v7  ;;  %v458_v56 = vsub.f32 1.0, %v454_v1 }
 0x12b   : > { %v503_v8 = vmul.f32 %v499_v0, %v1623_v59  ;;  %v497_v9 = vmul.f32 %v493_v3, %v461_v10  ;;  %v724_v59 = vld [vmem:[#allocation2 + $0x80] sm:$0xff]  ;;  %v725_v10 = vld [vmem:[#allocation2 + $0x88] sm:$0xff] }
 0x12c   : > { %v502_v12 = vadd.f32 1.0, %v498_v5  ;;  %v508_v14 = vmul.f32 %v504_v42, %v456_v11  ;;  %v1359_v18 = vpack.c.bf16 %v725_v10, %v724_v59 }
 0x12d   : > { %v507_v54 = vmul.f32 %v503_v8, %v455_v6  ;;  %v501_v13 = vadd.f32 1.0, %v497_v9 }
 0x12e   : > { %v506_v15 = vmul.f32 %v502_v12, %v1631_v2  ;;  %1360 = vmatprep.subr.bf16.mxu0 %v1359_v18  ;;  %v728_v2 = vld [vmem:[#allocation2 + $0xa0] sm:$0xff] }
 0x12f   : > { %1245 = vmatprep.mubr.f32.mxu1 %v507_v54  ;;  %v505_v16 = vmul.f32 %v501_v13, %v1633_v4  ;;  %1362 = vmatpush3.bf16.msra.mxu0 %v1359_v18  ;;  %v1367_v23 = vpack.c.bf16 %v729_v22, %v728_v2  ;;  %v730_v4 = vld [vmem:[#allocation2 + $0xb0] sm:$0xff] }
 0x130   : > { %1246 = vmatmul.mubr.f32.vlgmr.msra.gmra.mrb[0].mxu1 %v508_v14  ;;  %v510_v17 = vmul.f32 %v506_v15, %v458_v56  ;;  %1364 = vmatprep.subr.bf16.mxu0 %v1363_v21  ;;  %v1371_v25 = vpack.c.bf16 %v731_v24, %v730_v4 }
 0x131   : > { %v509_v7 = vmul.f32 %v505_v16, %v457_v52 }
 0x133   : > { %1248 = vmatprep.mubr.f32.mxu1 %v509_v7  ;;  %1366 = vmatpush3.bf16.msra.mxu0 %v1363_v21 }
 0x134   : > { %1249 = vmatmul.mubr.f32.gmra.mrb[2].mxu1 %v510_v17  ;;  %1368 = vmatprep.subr.bf16.mxu0 %v1367_v23 }
 0x137   : > { %1370 = vmatpush3.bf16.msra.mxu0 %v1367_v23 }
 0x138   : > { %1372 = vmatprep.subr.bf16.mxu0 %v1371_v25 }
 0x13b   : > { %1374 = vmatpush3.bf16.msra.mxu0 %v1371_v25 }
 0x13c   : > { %1376 = vmatprep.subr.bf16.mxu0 %v1375_v28 }
 0x13f   : > { %1378 = vmatpush3.bf16.msra.mxu0 %v1375_v28 }
 0x140   : > { %1380 = vmatprep.subr.bf16.mxu0 %v1379_v31 }
 0x143   : > { %1382 = vmatpush3.bf16.msra.mxu0 %v1379_v31 }
 0x144   : > { %1384 = vmatprep.subr.bf16.mxu0 %v1383_v34 }
 0x147   : > { %1386 = vmatpush3.bf16.msra.mxu0 %v1383_v34 }
 0x148   : > { %1388 = vmatprep.subr.bf16.mxu0 %v1387_v37 }
 0x14b   : > { %1390 = vmatpush3.bf16.msra.mxu0 %v1387_v37 }
 0x203   : > { %v1247_v39 = vpop.f32.mrb[0].mxu1 }
 0x204   : > { %v606_v40 = vadd.f32 %v1247_v39, %v1134_v38  ;;  %v600_v41 = vpop.f32.mrb[1].mxu1 }
 0x205   : > { %v601_v43 = vadd.f32 %v1134_v38, %v600_v41 }
 0x206   : > { %v620_v45 = vmul.f32 0.31830987, %v606_v40 }
 0x207   : > { %v619_v46 = vmul.f32 0.31830987, %v601_v43  ;;  %v1250_v47 = vpop.f32.mrb[2].mxu1 }
 0x208   : > { %v624_v48 = vadd.f32 0.5, %v620_v45  ;;  %v616_v49 = vadd.f32 %v1250_v47, %v1134_v38  ;;  %v610_v50 = vpop.f32.mrb[3].mxu1 }
 0x209   : > { %v623_v51 = vadd.f32 0.5, %v619_v46  ;;  %v611_v53 = vadd.f32 %v1134_v38, %v610_v50 }
 0x20a   : > { %v1654_v55 = vfloor.f32 %v624_v48  ;;  %v622_v57 = vmul.f32 0.31830987, %v616_v49 }
 0x20b   : > { %v1656_v58 = vfloor.f32 %v623_v51  ;;  %v621_v61 = vmul.f32 0.31830987, %v611_v53 }
 0x20c   : > { %v632_v62 = vmul.f32 3.140625, %v1654_v55  ;;  %v626_v44 = vadd.f32 0.5, %v622_v57  ;;  %v640_v42 = vmul.f32 0.0009676536, %v1654_v55  ;;  %v648_v18 = vmul.f32 0.5, %v1654_v55 }
 0x20d   : > { %v631_v63 = vmul.f32 3.140625, %v1656_v58  ;;  %v625_v0 = vadd.f32 0.5, %v621_v61  ;;  %v639_v8 = vmul.f32 0.0009676536, %v1656_v58  ;;  %v647_v59 = vmul.f32 0.5, %v1656_v58 }
 0x20e   : > { %v636_v3 = vsub.f32 %v606_v40, %v632_v62  ;;  %v1661_v5 = vfloor.f32 %v626_v44  ;;  %v652_v27 = vfloor.f32 %v648_v18 }
 0x20f   : > { %v635_v6 = vsub.f32 %v601_v43, %v631_v63  ;;  %v1664_v60 = vfloor.f32 %v625_v0  ;;  %v651_v4 = vfloor.f32 %v647_v59 }
 0x210   : > { %v1666_v9 = vsub.f32 %v636_v3, %v640_v42  ;;  %v634_v11 = vmul.f32 3.140625, %v1661_v5  ;;  %v642_v14 = vmul.f32 0.0009676536, %v1661_v5  ;;  %v650_v29 = vmul.f32 0.5, %v1661_v5 }
 0x211   : > { %v1669_v1 = vsub.f32 %v635_v6, %v639_v8  ;;  %v633_v12 = vmul.f32 3.140625, %v1664_v60  ;;  %v641_v16 = vmul.f32 0.0009676536, %v1664_v60  ;;  %v649_v25 = vmul.f32 0.5, %v1664_v60 }
 0x212   : > { %v672_v54 = vmul.f32 %v1666_v9, %v1666_v9  ;;  %v638_v13 = vsub.f32 %v616_v49, %v634_v11  ;;  %v655_v35 = vmul.f32 2.0, %v651_v4  ;;  %v656_v39 = vmul.f32 2.0, %v652_v27 }
 0x213   : > { %v671_v15 = vmul.f32 %v1669_v1, %v1669_v1  ;;  %v637_v52 = vsub.f32 %v611_v53, %v633_v12  ;;  %v653_v37 = vfloor.f32 %v649_v25  ;;  %v654_v41 = vfloor.f32 %v650_v29  ;;  %v941_v29 = vld [vmem:[%s1809_s5 + $0x20] sm:$0xff] }
 0x214   : > { %v676_v56 = vmul.f32 -2.5052108e-08, %v672_v54  ;;  %v1678_v7 = vsub.f32 %v638_v13, %v642_v14  ;;  %v659_v49 = vsub.f32 %v1656_v58, %v655_v35  ;;  %v660_v57 = vsub.f32 %v1654_v55, %v656_v39  ;;  %v945_v35 = vld [vmem:[%s1809_s5 + $0x40] sm:$0xff]  ;;  %v948_v39 = vld [vmem:[%s1809_s5 + $0x58] sm:$0xff] }
 0x215   : > { %v1680_v17 = vsub.f32 %v637_v52, %v641_v16  ;;  %v675_v10 = vmul.f32 -2.5052108e-08, %v671_v15  ;;  %v657_v51 = vmul.f32 2.0, %v653_v37  ;;  %v658_v62 = vmul.f32 2.0, %v654_v41  ;;  %v949_v41 = vld [vmem:[%s1809_s5 + $0x60] sm:$0xff] }
 0x216   : > { %v680_v19 = vadd.f32 2.7557319e-06, %v676_v56  ;;  %v674_v20 = vmul.f32 %v1678_v7, %v1678_v7  ;;  %v663_v6 = vmul.f32 2.0, %v659_v49  ;;  %v664_v13 = vmul.f32 2.0, %v660_v57  ;;  %v1136_v49 = vld [vmem:[%s1808_s4 + $0x1] ss:$0 sm:$0xff] }
 0x217   : > { %v673_v21 = vmul.f32 %v1680_v17, %v1680_v17  ;;  %v679_v2 = vadd.f32 2.7557319e-06, %v675_v10  ;;  %v661_v11 = vsub.f32 %v1664_v60, %v657_v51  ;;  %v662_v58 = vsub.f32 %v1661_v5, %v658_v62 }
 0x218   : > { %v684_v22 = vmul.f32 %v680_v19, %v672_v54  ;;  %v678_v23 = vmul.f32 -2.5052108e-08, %v674_v20  ;;  %v667_v10 = vsub.f32 1.0, %v663_v6 }
 0x219   : > { %v683_v24 = vmul.f32 %v679_v2, %v671_v15  ;;  %v677_v26 = vmul.f32 -2.5052108e-08, %v673_v21  ;;  %v668_v2 = vsub.f32 1.0, %v664_v13 }
 0x21a   : > { %v688_v28 = vadd.f32 -0.0001984127, %v684_v22  ;;  %v682_v30 = vadd.f32 2.7557319e-06, %v678_v23 }
 0x21b   : > { %v687_v31 = vadd.f32 -0.0001984127, %v683_v24  ;;  %v681_v32 = vadd.f32 2.7557319e-06, %v677_v26 }
 0x21c   : > { %v692_v33 = vmul.f32 %v688_v28, %v672_v54  ;;  %v686_v34 = vmul.f32 %v682_v30, %v674_v20  ;;  %v942_v30 = vld [vmem:[%s1809_s5 + $0x28] sm:$0xff] }
 0x21d   : > { %v691_v36 = vmul.f32 %v687_v31, %v671_v15  ;;  %v685_v38 = vmul.f32 %v681_v32, %v673_v21  ;;  %v1399_v31 = vpack.c.bf16 %v942_v30, %v941_v29  ;;  %v943_v32 = vld [vmem:[%s1809_s5 + $0x30] sm:$0xff] }
 0x21e   : > { %v696_v40 = vadd.f32 0.008333334, %v692_v33  ;;  %v690_v43 = vadd.f32 -0.0001984127, %v686_v34  ;;  %v944_v33 = vld [vmem:[%s1809_s5 + $0x38] sm:$0xff] }
 0x21f   : > { %v695_v45 = vadd.f32 0.008333334, %v691_v36  ;;  %v689_v46 = vadd.f32 -0.0001984127, %v685_v38  ;;  %v1403_v34 = vpack.c.bf16 %v944_v33, %v943_v32  ;;  %v946_v36 = vld [vmem:[%s1809_s5 + $0x48] sm:$0xff]  ;;  %v947_v38 = vld [vmem:[%s1809_s5 + $0x50] sm:$0xff] }
 0x220   : > { %v700_v47 = vmul.f32 %v696_v40, %v672_v54  ;;  %v694_v48 = vmul.f32 %v690_v43, %v674_v20  ;;  %v1407_v37 = vpack.c.bf16 %v946_v36, %v945_v35  ;;  %v1411_v40 = vpack.c.bf16 %v948_v39, %v947_v38  ;;  %v950_v43 = vld [vmem:[%s1809_s5 + $0x68] sm:$0xff] }
 0x221   : > { %v699_v50 = vmul.f32 %v695_v45, %v671_v15  ;;  %v693_v53 = vmul.f32 %v689_v46, %v673_v21  ;;  %v1415_v45 = vpack.c.bf16 %v950_v43, %v949_v41  ;;  %v951_v46 = vld [vmem:[%s1809_s5 + $0x70] sm:$0xff] }
 0x222   : > { %v704_v61 = vadd.f32 -0.16666667, %v700_v47  ;;  %v698_v44 = vadd.f32 0.008333334, %v694_v48  ;;  %v952_v47 = vld [vmem:[%s1809_s5 + $0x78] sm:$0xff] }
 0x223   : > { %v703_v63 = vadd.f32 -0.16666667, %v699_v50  ;;  %v697_v0 = vadd.f32 0.008333334, %v693_v53  ;;  %v1419_v48 = vpack.c.bf16 %v952_v47, %v951_v46 }
 0x224   : > { %v708_v3 = vmul.f32 %v704_v61, %v672_v54  ;;  %v702_v42 = vmul.f32 %v698_v44, %v674_v20  ;;  %v665_v54 = vmul.f32 2.0, %v661_v11 }
 0x225   : > { %v707_v8 = vmul.f32 %v703_v63, %v671_v15  ;;  %v701_v12 = vmul.f32 %v697_v0, %v673_v21  ;;  %v666_v15 = vmul.f32 2.0, %v662_v58 }
 0x226   : > { %v712_v14 = vadd.f32 1.0, %v708_v3  ;;  %v706_v52 = vadd.f32 -0.16666667, %v702_v42  ;;  %v669_v5 = vsub.f32 1.0, %v665_v54 }
 0x227   : > { %v711_v16 = vadd.f32 1.0, %v707_v8  ;;  %v705_v56 = vadd.f32 -0.16666667, %v701_v12 }
 0x228   : > { %v716_v55 = vmul.f32 %v712_v14, %v1666_v9  ;;  %v710_v59 = vmul.f32 %v706_v52, %v674_v20  ;;  %v670_v9 = vsub.f32 1.0, %v666_v15 }
 0x229   : > { %v715_v18 = vmul.f32 %v711_v16, %v1669_v1  ;;  %v709_v19 = vmul.f32 %v705_v56, %v673_v21  ;;  %v937_v1 = vld [vmem:[%s1809_s5] sm:$0xff]  ;;  %v938_v21 = vld [vmem:[%s1809_s5 + $0x8] sm:$0xff] }
 0x22a   : > { %v714_v22 = vadd.f32 1.0, %v710_v59  ;;  %v720_v4 = vmul.f32 %v716_v55, %v668_v2  ;;  %v1391_v27 = vpack.c.bf16 %v938_v21, %v937_v1 }
 0x22b   : > { %v719_v60 = vmul.f32 %v715_v18, %v667_v10  ;;  %v713_v23 = vadd.f32 1.0, %v709_v19 }
 0x22c   : > { %v718_v24 = vmul.f32 %v714_v22, %v1678_v7  ;;  %1392 = vmatprep.subr.bf16.mxu0 %v1391_v27  ;;  %1423 = vmatprep.subr.bf16.mxu1 %v1391_v27  ;;  %v939_v7 = vld [vmem:[%s1809_s5 + $0x10] sm:$0xff] }
 0x22d   : > { %1283 = vmatprep.mubr.f32.mxu0 %v719_v60  ;;  %v717_v25 = vmul.f32 %v713_v23, %v1680_v17  ;;  %v940_v17 = vld [vmem:[%s1809_s5 + $0x18] sm:$0xff]  ;;  %1431 = vmatpush3.bf16.msra.mxu1 %v1391_v27 }
 0x22e   : > { %1284 = vmatmul.mubr.f32.vlgmr.msra.gmra.mrb[4].mxu0 %v720_v4  ;;  %v722_v26 = vmul.f32 %v718_v24, %v670_v9  ;;  %v1395_v28 = vpack.c.bf16 %v940_v17, %v939_v7 }
 0x22f   : > { %v721_v20 = vmul.f32 %v717_v25, %v669_v5  ;;  %1394 = vmatpush3.bf16.msra.mxu0 %v1391_v27 }
 0x230   : > { %1396 = vmatprep.subr.bf16.mxu0 %v1395_v28  ;;  %1424 = vmatprep.subr.bf16.mxu1 %v1395_v28 }
 0x231   : > { %1286 = vmatprep.mubr.f32.mxu0 %v721_v20  ;;  %1432 = vmatpush3.bf16.msra.mxu1 %v1395_v28 }
 0x232   : > { %1287 = vmatmul.mubr.f32.gmra.mrb[6].mxu0 %v722_v26  ;;  %1425 = vmatprep.subr.bf16.mxu1 %v1399_v31 }
 0x233   : > { %1398 = vmatpush3.bf16.msra.mxu0 %v1395_v28 }
 0x234   : > { %1400 = vmatprep.subr.bf16.mxu0 %v1399_v31 }
 0x235   : > { %1433 = vmatpush3.bf16.msra.mxu1 %v1399_v31 }
 0x236   : > { %1426 = vmatprep.subr.bf16.mxu1 %v1403_v34 }
 0x237   : > { %1402 = vmatpush3.bf16.msra.mxu0 %v1399_v31 }
 0x238   : > { %1404 = vmatprep.subr.bf16.mxu0 %v1403_v34 }
 0x239   : > { %1434 = vmatpush3.bf16.msra.mxu1 %v1403_v34 }
 0x23a   : > { %1427 = vmatprep.subr.bf16.mxu1 %v1407_v37 }
 0x23b   : > { %1406 = vmatpush3.bf16.msra.mxu0 %v1403_v34 }
 0x23c   : > { %1408 = vmatprep.subr.bf16.mxu0 %v1407_v37 }
 0x23d   : > { %1435 = vmatpush3.bf16.msra.mxu1 %v1407_v37 }
 0x23e   : > { %1428 = vmatprep.subr.bf16.mxu1 %v1411_v40 }
 0x23f   : > { %1410 = vmatpush3.bf16.msra.mxu0 %v1407_v37 }
 0x240   : > { %1412 = vmatprep.subr.bf16.mxu0 %v1411_v40 }
 0x241   : > { %1436 = vmatpush3.bf16.msra.mxu1 %v1411_v40 }
 0x242   : > { %1429 = vmatprep.subr.bf16.mxu1 %v1415_v45 }
 0x243   : > { %1414 = vmatpush3.bf16.msra.mxu0 %v1411_v40 }
 0x244   : > { %1416 = vmatprep.subr.bf16.mxu0 %v1415_v45 }
 0x245   : > { %1437 = vmatpush3.bf16.msra.mxu1 %v1415_v45 }
 0x246   : > { %1430 = vmatprep.subr.bf16.mxu1 %v1419_v48 }
 0x247   : > { %1418 = vmatpush3.bf16.msra.mxu0 %v1415_v45 }
 0x248   : > { %1420 = vmatprep.subr.bf16.mxu0 %v1419_v48 }
 0x249   : > { %1438 = vmatpush3.bf16.msra.mxu1 %v1419_v48 }
 0x24b   : > { %1422 = vmatpush3.bf16.msra.mxu0 %v1419_v48 }
 0x301   : > { %v1285_v50 = vpop.f32.mrb[4].mxu0 }
 0x302   : > { %v820_v51 = vadd.f32 %v1285_v50, %v1136_v49  ;;  %v814_v53 = vpop.f32.mrb[5].mxu0 }
 0x303   : > { %v815_v57 = vadd.f32 %v1136_v49, %v814_v53 }
 0x304   : > { %v834_v61 = vmul.f32 0.31830987, %v820_v51 }
 0x305   : > { %v833_v62 = vmul.f32 0.31830987, %v815_v57  ;;  %v1288_v44 = vpop.f32.mrb[6].mxu0 }
 0x306   : > { %v838_v63 = vadd.f32 0.5, %v834_v61  ;;  %v830_v0 = vadd.f32 %v1288_v44, %v1136_v49  ;;  %v824_v3 = vpop.f32.mrb[7].mxu0 }
 0x307   : > { %v837_v42 = vadd.f32 0.5, %v833_v62  ;;  %v825_v6 = vadd.f32 %v1136_v49, %v824_v3 }
 0x308   : > { %v1749_v8 = vfloor.f32 %v838_v63  ;;  %v836_v11 = vmul.f32 0.31830987, %v830_v0 }
 0x309   : > { %v1751_v12 = vfloor.f32 %v837_v42  ;;  %v835_v13 = vmul.f32 0.31830987, %v825_v6 }
 0x30a   : > { %v846_v14 = vmul.f32 3.140625, %v1749_v8  ;;  %v840_v58 = vadd.f32 0.5, %v836_v11  ;;  %v854_v55 = vmul.f32 0.0009676536, %v1749_v8  ;;  %v862_v27 = vmul.f32 0.5, %v1749_v8 }
 0x30b   : > { %v845_v52 = vmul.f32 3.140625, %v1751_v12  ;;  %v839_v16 = vadd.f32 0.5, %v835_v13  ;;  %v853_v18 = vmul.f32 0.0009676536, %v1751_v12  ;;  %v861_v1 = vmul.f32 0.5, %v1751_v12 }
 0x30c   : > { %v850_v56 = vsub.f32 %v820_v51, %v846_v14  ;;  %v1756_v59 = vfloor.f32 %v840_v58  ;;  %v866_v36 = vfloor.f32 %v862_v27 }
 0x30d   : > { %v849_v10 = vsub.f32 %v815_v57, %v845_v52  ;;  %v1759_v54 = vfloor.f32 %v839_v16  ;;  %v865_v32 = vfloor.f32 %v861_v1 }
 0x30e   : > { %v1761_v19 = vsub.f32 %v850_v56, %v854_v55  ;;  %v848_v2 = vmul.f32 3.140625, %v1756_v59  ;;  %v856_v4 = vmul.f32 0.0009676536, %v1756_v59  ;;  %v864_v38 = vmul.f32 0.5, %v1756_v59 }
 0x30f   : > { %v1764_v15 = vsub.f32 %v849_v10, %v853_v18  ;;  %v847_v22 = vmul.f32 3.140625, %v1759_v54  ;;  %v855_v25 = vmul.f32 0.0009676536, %v1759_v54  ;;  %v863_v34 = vmul.f32 0.5, %v1759_v54 }
 0x310   : > { %v886_v60 = vmul.f32 %v1761_v19, %v1761_v19  ;;  %v852_v23 = vsub.f32 %v830_v0, %v848_v2  ;;  %v869_v46 = vmul.f32 2.0, %v865_v32  ;;  %v870_v50 = vmul.f32 2.0, %v866_v36 }
 0x311   : > { %v885_v24 = vmul.f32 %v1764_v15, %v1764_v15  ;;  %v851_v5 = vsub.f32 %v825_v6, %v847_v22  ;;  %v867_v48 = vfloor.f32 %v863_v34  ;;  %v868_v53 = vfloor.f32 %v864_v38 }
 0x312   : > { %v890_v9 = vmul.f32 -2.5052108e-08, %v886_v60  ;;  %v1773_v20 = vsub.f32 %v852_v23, %v856_v4  ;;  %v873_v0 = vsub.f32 %v1751_v12, %v869_v46  ;;  %v874_v11 = vsub.f32 %v1749_v8, %v870_v50 }
 0x313   : > { %v1775_v26 = vsub.f32 %v851_v5, %v855_v25  ;;  %v889_v21 = vmul.f32 -2.5052108e-08, %v885_v24  ;;  %v871_v42 = vmul.f32 2.0, %v867_v48  ;;  %v872_v14 = vmul.f32 2.0, %v868_v53 }
 0x314   : > { %v894_v7 = vadd.f32 2.7557319e-06, %v890_v9  ;;  %v888_v17 = vmul.f32 %v1773_v20, %v1773_v20  ;;  %v877_v10 = vmul.f32 2.0, %v873_v0  ;;  %v878_v23 = vmul.f32 2.0, %v874_v11 }
 0x315   : > { %v887_v28 = vmul.f32 %v1775_v26, %v1775_v26  ;;  %v893_v29 = vadd.f32 2.7557319e-06, %v889_v21  ;;  %v875_v2 = vsub.f32 %v1759_v54, %v871_v42  ;;  %v876_v12 = vsub.f32 %v1756_v59, %v872_v14 }
 0x316   : > { %v898_v30 = vmul.f32 %v894_v7, %v886_v60  ;;  %v892_v31 = vmul.f32 -2.5052108e-08, %v888_v17  ;;  %v881_v21 = vsub.f32 1.0, %v877_v10 }
 0x317   : > { %v897_v33 = vmul.f32 %v893_v29, %v885_v24  ;;  %v891_v35 = vmul.f32 -2.5052108e-08, %v887_v28  ;;  %v882_v29 = vsub.f32 1.0, %v878_v23 }
 0x318   : > { %v902_v37 = vadd.f32 -0.0001984127, %v898_v30  ;;  %v896_v39 = vadd.f32 2.7557319e-06, %v892_v31 }
 0x319   : > { %v901_v40 = vadd.f32 -0.0001984127, %v897_v33  ;;  %v895_v41 = vadd.f32 2.7557319e-06, %v891_v35 }
 0x31a   : > { %v906_v43 = vmul.f32 %v902_v37, %v886_v60  ;;  %v900_v45 = vmul.f32 %v896_v39, %v888_v17 }
 0x31b   : > { %v905_v47 = vmul.f32 %v901_v40, %v885_v24  ;;  %v899_v49 = vmul.f32 %v895_v41, %v887_v28 }
 0x31c   : > { %v910_v51 = vadd.f32 0.008333334, %v906_v43  ;;  %v904_v57 = vadd.f32 -0.0001984127, %v900_v45 }
 0x31d   : > { %v909_v61 = vadd.f32 0.008333334, %v905_v47  ;;  %v903_v62 = vadd.f32 -0.0001984127, %v899_v49 }
 0x31e   : > { %v914_v44 = vmul.f32 %v910_v51, %v886_v60  ;;  %v908_v63 = vmul.f32 %v904_v57, %v888_v17 }
 0x31f   : > { %v913_v3 = vmul.f32 %v909_v61, %v885_v24  ;;  %v907_v6 = vmul.f32 %v903_v62, %v887_v28 }
 0x320   : > { %v918_v13 = vadd.f32 -0.16666667, %v914_v44  ;;  %v912_v58 = vadd.f32 0.008333334, %v908_v63 }
 0x321   : > { %v917_v52 = vadd.f32 -0.16666667, %v913_v3  ;;  %v911_v16 = vadd.f32 0.008333334, %v907_v6 }
 0x322   : > { %v922_v56 = vmul.f32 %v918_v13, %v886_v60  ;;  %v916_v55 = vmul.f32 %v912_v58, %v888_v17  ;;  %v879_v60 = vmul.f32 2.0, %v875_v2 }
 0x323   : > { %v921_v18 = vmul.f32 %v917_v52, %v885_v24  ;;  %v915_v22 = vmul.f32 %v911_v16, %v887_v28  ;;  %v880_v24 = vmul.f32 2.0, %v876_v12 }
 0x324   : > { %v926_v4 = vadd.f32 1.0, %v922_v56  ;;  %v920_v5 = vadd.f32 -0.16666667, %v916_v55  ;;  %v883_v33 = vsub.f32 1.0, %v879_v60 }
 0x325   : > { %v925_v25 = vadd.f32 1.0, %v921_v18  ;;  %v919_v9 = vadd.f32 -0.16666667, %v915_v22 }
 0x326   : > { %v930_v8 = vmul.f32 %v926_v4, %v1761_v19  ;;  %v924_v1 = vmul.f32 %v920_v5, %v888_v17  ;;  %v884_v19 = vsub.f32 1.0, %v880_v24 }
 0x327   : > { %v929_v27 = vmul.f32 %v925_v25, %v1764_v15  ;;  %v923_v7 = vmul.f32 %v919_v9, %v887_v28  ;;  %v1137_v15 = vld [vmem:[%s1810_s6] ss:$0 sm:$0xff] }
 0x328   : > { %v928_v30 = vadd.f32 1.0, %v924_v1  ;;  %v934_v32 = vmul.f32 %v930_v8, %v882_v29 }
 0x329   : > { %v933_v54 = vmul.f32 %v929_v27, %v881_v21  ;;  %v927_v31 = vadd.f32 1.0, %v923_v7 }
 0x32a   : > { %v932_v59 = vmul.f32 %v928_v30, %v1773_v20 }
 0x32b   : > { %1321 = vmatprep.mubr.f32.mxu0 %v933_v54  ;;  %v931_v34 = vmul.f32 %v927_v31, %v1775_v26 }
 0x32c   : > { %1322 = vmatmul.mubr.f32.vlgmr.msra.gmra.mrb[8].mxu0 %v934_v32  ;;  %v936_v35 = vmul.f32 %v932_v59, %v884_v19 }
 0x32d   : > { %v935_v17 = vmul.f32 %v931_v34, %v883_v33 }
 0x32f   : > { %1324 = vmatprep.mubr.f32.mxu1 %v935_v17 }
 0x330   : > { %1325 = vmatmul.mubr.f32.vlgmr.msra.gmra.mrb[4].mxu1 %v936_v35 }
 0x3ff   : > { %v1323_v28 = vpop.f32.mrb[8].mxu0 }
 0x400   : > { %v1026_v20 = vpop.f32.mrb[9].mxu0  ;;  %v1032_v26 = vadd.f32 %v1323_v28, %v1137_v15 }
 0x401   : > { %v1027_v36 = vadd.f32 %v1137_v15, %v1026_v20 }
 0x402   : > { %1047 = vst.msk [vmem:[%s295_s30 + $0x8] sm:$0xff] %vm1045_vm1, %v1032_v26 }
 0x403   : > { %1046 = vst.msk [vmem:[%s295_s30] sm:$0xff] %vm1045_vm1, %v1027_v36  ;;  %v1326_v37 = vpop.f32.mrb[4].mxu1 }
 0x404   : > { %v1036_v38 = vpop.f32.mrb[5].mxu1  ;;  %v1042_v40 = vadd.f32 %v1326_v37, %v1137_v15 }
 0x405   : > { %v1037_v39 = vadd.f32 %v1137_v15, %v1036_v38 }
 0x406   : > { %1049 = vst.msk [vmem:[%s295_s30 + $0x18] sm:$0xff] %vm1045_vm1, %v1042_v40 }
 0x407   : > { %1048 = vst.msk [vmem:[%s295_s30 + $0x10] sm:$0xff] %vm1045_vm1, %v1037_v39 }
 0x408 PF: > { %s18_s24 = sadd.s32 1, %s1498_s24  }
 0x409   : > { %p15_p3 = scmp.ge.s32.totalorder %s18_s24, 4  }
 0x40b   :  { %17 = sbr.rel (!%p15_p3) target bundleno = 1 (0x1), region = 85 }
 0x412   :  { %1072 = vsyncpa [#allocation3], 1 }
 0x413   :  { %1074 = vsyncpa [#allocation3 + $0x1], 1 }

</bundles_post_ra>
